<compile_context>
chip_gen: v5e
topology: v5e:2x2
jax: 0.10.0
libtpu: 0.0.40
codegen_flags: <defaults>
</compile_context>

<pallas_src>
import functools

import jax
import jax.numpy as jnp
from jax import lax
from jax.experimental import pallas as pl
from jax.experimental.pallas import tpu as pltpu


def _round_up(x, m):
    return ((x + m - 1) // m) * m


def _cdiv(a, b):
    return -(-a // b)


# ---------------------------------------------------------------------------
# Kernel 1: fused BPR loss + L2 regularization (single pallas_call)
#
#   s_pos = sum(u_pos * b_pos, -1)    s_neg = sum(u_neg * b_neg, -1)
#   bpr   = mean(softplus(s_neg - s_pos))
#   ssq   = sum(all_emb ** 2)              (streamed, lane-dense, per-group)
#   l2    = l2_reg * 0.5 * ssq ; loss = bpr + l2   (tiny final combine in wrapper)
#
# Grid: (group, chunk).  `group` is "parallel" (megacore sharding on v7x),
# `chunk` is "arbitrary" (reduction).  The (8,128) ssq partial per group lives
# in the resident output block (same block index across the chunk axis).
# ---------------------------------------------------------------------------
def _fused_loss_kernel(up_ref, un_ref, bp_ref, bn_ref, emb_ref,
                       ssq_ref, bpr_ref, *, sub_tiles):
    g = pl.program_id(0)
    c = pl.program_id(1)

    @pl.when(c == 0)
    def _init():
        ssq_ref[...] = jnp.zeros_like(ssq_ref)
        bpr_ref[...] = jnp.zeros_like(bpr_ref)

    @pl.when(jnp.logical_and(c == 0, g == 0))
    def _bpr():
        # pos / neg arrive as separate (B, D) slabs -> no sublane-misaligned slice.
        s_pos = jnp.sum(up_ref[...] * bp_ref[...], axis=-1, keepdims=True)  # (B,1)
        s_neg = jnp.sum(un_ref[...] * bn_ref[...], axis=-1, keepdims=True)  # (B,1)
        x = s_neg - s_pos
        # numerically stable softplus (matches torch.nn.functional.softplus)
        sp = jnp.maximum(x, 0.0) + jnp.log1p(jnp.exp(-jnp.abs(x)))
        bpr_ref[...] = jnp.broadcast_to(jnp.mean(sp), (8, 128))

    # Lane-dense streamed sum of squares.  Pure VPU per step: square, then
    # elementwise-accumulate (chunk_rows//8) sub-tiles into the (8,128) partial.
    # No cross-lane/sublane (XLU) reduce on the streaming critical path.
    x = emb_ref[...]                                            # (chunk_rows, 128)
    sq = x * x
    ssq_ref[...] += jnp.sum(sq.reshape(sub_tiles, 8, 128), axis=0)


def fused_bpr_l2_loss(u_pos, u_neg, b_pos, b_neg, all_emb, *, l2_reg,
                      chunk_rows=4096, num_groups=2):
    """u_pos/u_neg/b_pos/b_neg: (B, D); all_emb: (N, D).  Returns (l2, loss)."""
    batch, d = u_pos.shape
    assert u_neg.shape == (batch, d) and b_pos.shape == (batch, d)
    assert b_neg.shape == (batch, d) and all_emb.shape[1] == d

    # Lane-dense view of the table: Frobenius norm is order-independent, so the
    # flatten/reshape is semantically free (and can be hoisted / pre-stored by
    # the caller since all_emb is a parameter).
    flat = all_emb.reshape(-1)
    n_elems = flat.shape[0]
    n_pad = _round_up(n_elems, 8 * 128)
    if n_pad != n_elems:                      # zero pad contributes 0 to ssq
        flat = jnp.pad(flat, (0, n_pad - n_elems))
    emb2d = flat.reshape(-1, 128)             # (R, 128)
    r = emb2d.shape[0]

    # ~2 MiB blocks (f32) so the stream is HBM-bound, not per-step-overhead bound.
    chunk_rows = max(8, _round_up(min(chunk_rows, r), 8))
    n_chunks = _cdiv(r, chunk_rows)
    groups = max(1, min(num_groups, n_chunks))   # parallel axis (2 TCs on v7x)
    cpg = _cdiv(n_chunks, groups)                # chunks per group
    r_pad = groups * cpg * chunk_rows
    if r_pad != r:
        emb2d = jnp.pad(emb2d, ((0, r_pad - r), (0, 0)))

    kernel = functools.partial(_fused_loss_kernel, sub_tiles=chunk_rows // 8)
    tiny_spec = pl.BlockSpec((batch, d), lambda g, c: (0, 0))

    ssq_parts, bpr_parts = pl.pallas_call(
        kernel,
        out_shape=(jax.ShapeDtypeStruct((groups, 8, 128), jnp.float32),
                   jax.ShapeDtypeStruct((groups, 8, 128), jnp.float32)),
        grid=(groups, cpg),
        in_specs=[tiny_spec, tiny_spec, tiny_spec, tiny_spec,
                  pl.BlockSpec((chunk_rows, 128),
                               lambda g, c: (g * cpg + c, 0))],
        out_specs=(pl.BlockSpec((None, 8, 128), lambda g, c: (g, 0, 0)),
                   pl.BlockSpec((None, 8, 128), lambda g, c: (g, 0, 0))),
        compiler_params=pltpu.CompilerParams(
            dimension_semantics=("parallel", "arbitrary")),
    )(u_pos, u_neg, b_pos, b_neg, emb2d)

    # Tiny final combine in the wrapper (sum of G*(8,128) partials + BPR term).
    ssq = jnp.sum(ssq_parts)
    l2 = (0.5 * float(l2_reg)) * ssq
    loss = bpr_parts[0, 0, 0] + l2
    return l2, loss


# ---------------------------------------------------------------------------
# Kernel 2: evaluate — scores = users_embedding @ bundles_feature.T
#   bundles stay (NB, D): contraction on the last dims in-kernel (no wrapper
#   transpose pass over HBM).  Grid = (bundle tiles, user tiles) with the user
#   axis innermost so the bundle tile is resident and the bundle table is read
#   exactly once.  bf16 operands, f32 MXU accumulate, bf16 lane-dense output
#   (the kernel is output-writeback bound for embedding-sized D).
# ---------------------------------------------------------------------------
def _eval_kernel(u_ref, b_ref, o_ref):
    acc = lax.dot_general(u_ref[...], b_ref[...],
                          dimension_numbers=(((1,), (1,)), ((), ())),
                          preferred_element_type=jnp.float32)   # (tm, tn)
    o_ref[...] = acc.astype(o_ref.dtype)


def evaluate(users_embedding, bundles_feature, *, tm=256, tn=1024,
             compute_dtype=jnp.bfloat16, out_dtype=jnp.bfloat16):
    m, d = users_embedding.shape
    nb, d2 = bundles_feature.shape
    assert d == d2

    tm = max(8, min(_round_up(tm, 8), _round_up(m, 8)))
    tn = max(128, min(_round_up(tn, 128), _round_up(nb, 128)))
    m_pad = _round_up(m, tm)
    nb_pad = _round_up(nb, tn)

    u = users_embedding.astype(compute_dtype)
    b = bundles_feature.astype(compute_dtype)
    if m_pad != m:
        u = jnp.pad(u, ((0, m_pad - m), (0, 0)))
    if nb_pad != nb:
        b = jnp.pad(b, ((0, nb_pad - nb), (0, 0)))

    # VMEM budget (double-buffered): 2*(tm*D + tn*D)*2B + 2*tm*tn*sizeof(out)
    # — ~1.2 MiB at the defaults; keep under the 32 MiB scoped limit on all
    # generations (v7x physical VMEM is 64 MiB) when scaling tiles or D.
    scores = pl.pallas_call(
        _eval_kernel,
        out_shape=jax.ShapeDtypeStruct((m_pad, nb_pad), out_dtype),
        grid=(nb_pad // tn, m_pad // tm),          # user axis innermost
        in_specs=[
            pl.BlockSpec((tm, d), lambda j, i: (i, 0)),
            pl.BlockSpec((tn, d), lambda j, i: (j, 0)),   # resident per j
        ],
        out_specs=pl.BlockSpec((tm, tn), lambda j, i: (i, j)),
        compiler_params=pltpu.CompilerParams(
            dimension_semantics=("parallel", "parallel"),
            vmem_limit_bytes=32 * 1024 * 1024),
    )(u, b)
    return scores[:m, :nb]


# ---------------------------------------------------------------------------
# BundleGT forward (JAX glue around the fused Pallas loss kernel)
# ---------------------------------------------------------------------------
def bundlegt_forward(params, batch, l2_reg, *, chunk_rows=4096, num_groups=2):
    users, bundles = batch                  # users: (B, 2), bundles: (B, 2)
    all_emb = params["all_emb"]
    nu = params["num_users"]

    # propagate(): TODO(synk) HGT propagation not available; identity pass-through.
    # Gather batch rows from the fused table (bundles live at row offset nu).
    # Pos / neg kept in separate slabs (no sublane-misaligned slicing in-kernel).
    u_pos = all_emb[users[:, 0]]
    u_neg = all_emb[users[:, 1]]
    b_pos = all_emb[bundles[:, 0] + nu]
    b_neg = all_emb[bundles[:, 1] + nu]

    l2, loss = fused_bpr_l2_loss(u_pos, u_neg, b_pos, b_neg, all_emb,
                                 l2_reg=l2_reg, chunk_rows=chunk_rows,
                                 num_groups=num_groups)
    return {"l2": l2, "loss": loss}


if __name__ == "__main__":
    # Small, self-consistent synthetic configuration.
    num_users, num_bundles, num_items = 64, 48, 80
    embedding_size = 32
    batch_size = 8
    l2_reg = 1e-4

    key = jax.random.PRNGKey(0)
    k_emb, k_users, k_pos, k_neg = jax.random.split(key, 4)

    total_rows = num_users + num_bundles + num_items
    all_emb = 0.1 * jax.random.normal(k_emb, (total_rows, embedding_size),
                                      jnp.float32)
    params = {"all_emb": all_emb,
              "num_users": num_users,
              "num_bundles": num_bundles,
              "num_items": num_items}

    # Training batch: (users, bundles), each (B, 2) — col 0 positive, col 1 negative.
    u_idx = jax.random.randint(k_users, (batch_size,), 0, num_users)
    users = jnp.stack([u_idx, u_idx], axis=1)
    pos = jax.random.randint(k_pos, (batch_size,), 0, num_bundles)
    neg = jax.random.randint(k_neg, (batch_size,), 0, num_bundles)
    bundles = jnp.stack([pos, neg], axis=1)

    # Forward (loss path). Small chunk_rows/2 groups -> exercises the multi-step,
    # multi-group streamed L2 reduction (table flattens to 48 lane-dense rows).
    losses = bundlegt_forward(params, (users, bundles), l2_reg,
                              chunk_rows=16, num_groups=2)
    jax.block_until_ready(losses["loss"])

    # Evaluate path: all users against all bundles (multi-tile grid, padded NB).
    user_emb = all_emb[:num_users]
    bundle_emb = all_emb[num_users:num_users + num_bundles]
    eval_users = jnp.arange(num_users, dtype=jnp.int32)
    users_embedding = user_emb[eval_users]
    scores = evaluate(users_embedding, bundle_emb, tm=32, tn=128)
    jax.block_until_ready(scores)

    # --- Sanity checks against plain-JAX references ------------------------
    assert scores.shape == (num_users, num_bundles)
    u_bf = users_embedding.astype(jnp.bfloat16).astype(jnp.float32)
    b_bf = bundle_emb.astype(jnp.bfloat16).astype(jnp.float32)
    ref_scores = u_bf @ b_bf.T
    assert jnp.allclose(scores.astype(jnp.float32), ref_scores,
                        atol=1e-2, rtol=1e-2)

    u0 = user_emb[users[:, 0]]
    u1 = user_emb[users[:, 1]]
    b0 = bundle_emb[bundles[:, 0]]
    b1 = bundle_emb[bundles[:, 1]]
    s0 = jnp.sum(u0 * b0, -1)
    s1 = jnp.sum(u1 * b1, -1)
    ref_bpr = jnp.mean(jax.nn.softplus(s1 - s0))
    ref_l2 = l2_reg * 0.5 * jnp.sum(all_emb ** 2)
    assert jnp.allclose(losses["l2"], ref_l2, atol=1e-6)
    assert jnp.allclose(losses["loss"], ref_bpr + ref_l2, atol=1e-5)

    print("KERNEL_OK")
</pallas_src>

<mosaic_0001>
module attributes {stable_mosaic.version = 11 : i64} {
  func.func @_fused_loss_kernel(%arg0: i32, %arg1: i32, %arg2: memref<8x32xf32, #tpu.memory_space<vmem>>, %arg3: memref<8x32xf32, #tpu.memory_space<vmem>>, %arg4: memref<8x32xf32, #tpu.memory_space<vmem>>, %arg5: memref<8x32xf32, #tpu.memory_space<vmem>>, %arg6: memref<16x128xf32, #tpu.memory_space<vmem>>, %arg7: memref<1x8x128xf32, #tpu.memory_space<vmem>>, %arg8: memref<1x8x128xf32, #tpu.memory_space<vmem>>) attributes {dimension_semantics = [#tpu.dimension_semantics<parallel>, #tpu.dimension_semantics<arbitrary>], iteration_bounds = array<i64: 2, 2>, scalar_prefetch = 0 : i64, scratch_operands = 0 : i64, tpu.core_type = #tpu.core_type<tc>, window_params = [{pipeline_mode = #tpu.pipeline_mode<synchronous>, transform_indices = @transform_0, window_bounds = array<i64: 8, 32>}, {pipeline_mode = #tpu.pipeline_mode<synchronous>, transform_indices = @transform_1, window_bounds = array<i64: 8, 32>}, {pipeline_mode = #tpu.pipeline_mode<synchronous>, transform_indices = @transform_2, window_bounds = array<i64: 8, 32>}, {pipeline_mode = #tpu.pipeline_mode<synchronous>, transform_indices = @transform_3, window_bounds = array<i64: 8, 32>}, {transform_indices = @transform_4, window_bounds = array<i64: 16, 128>}, {transform_indices = @transform_5, window_bounds = array<i64: 1, 8, 128>}, {transform_indices = @transform_6, window_bounds = array<i64: 1, 8, 128>}]} {
    %c0_i32 = arith.constant 0 : i32
    %0 = arith.cmpi eq, %arg1, %c0_i32 : i32
    %1 = arith.extui %0 : i1 to i32
    %c0_i32_0 = arith.constant 0 : i32
    %2 = arith.cmpi ne, %1, %c0_i32_0 : i32
    scf.if %2 {
      %cst_11 = arith.constant 0.000000e+00 : f32
      %18 = vector.broadcast %cst_11 : f32 to vector<8x128xf32>
      %c0_12 = arith.constant 0 : index
      %c0_13 = arith.constant 0 : index
      %c0_14 = arith.constant 0 : index
      %19 = vector.load %arg7[%c0_12, %c0_13, %c0_14] : memref<1x8x128xf32, #tpu.memory_space<vmem>>, vector<1x8x128xf32>
      %20 = vector.shape_cast %19 : vector<1x8x128xf32> to vector<8x128xf32>
      %21 = vector.shape_cast %18 : vector<8x128xf32> to vector<1x8x128xf32>
      tpu.vector_store %arg7[%c0_12, %c0_13, %c0_14], %21 {strides = array<i32>} : memref<1x8x128xf32, #tpu.memory_space<vmem>>, vector<1x8x128xf32>,
      %cst_15 = arith.constant 0.000000e+00 : f32
      %22 = vector.broadcast %cst_15 : f32 to vector<8x128xf32>
      %c0_16 = arith.constant 0 : index
      %c0_17 = arith.constant 0 : index
      %c0_18 = arith.constant 0 : index
      %23 = vector.load %arg8[%c0_16, %c0_17, %c0_18] : memref<1x8x128xf32, #tpu.memory_space<vmem>>, vector<1x8x128xf32>
      %24 = vector.shape_cast %23 : vector<1x8x128xf32> to vector<8x128xf32>
      %25 = vector.shape_cast %22 : vector<8x128xf32> to vector<1x8x128xf32>
      tpu.vector_store %arg8[%c0_16, %c0_17, %c0_18], %25 {strides = array<i32>} : memref<1x8x128xf32, #tpu.memory_space<vmem>>, vector<1x8x128xf32>,
    } else {
    }
    %c0_i32_1 = arith.constant 0 : i32
    %3 = arith.cmpi eq, %arg1, %c0_i32_1 : i32
    %c0_i32_2 = arith.constant 0 : i32
    %4 = arith.cmpi eq, %arg0, %c0_i32_2 : i32
    %5 = arith.andi %3, %4 : i1
    %6 = arith.extui %5 : i1 to i32
    %c0_i32_3 = arith.constant 0 : i32
    %7 = arith.cmpi ne, %6, %c0_i32_3 : i32
    scf.if %7 {
      %c0_11 = arith.constant 0 : index
      %c0_12 = arith.constant 0 : index
      %18 = vector.load %arg2[%c0_11, %c0_12] : memref<8x32xf32, #tpu.memory_space<vmem>>, vector<8x32xf32>
      %c0_13 = arith.constant 0 : index
      %c0_14 = arith.constant 0 : index
      %19 = vector.load %arg4[%c0_13, %c0_14] : memref<8x32xf32, #tpu.memory_space<vmem>>, vector<8x32xf32>
      %20 = arith.mulf %18, %19 : vector<8x32xf32>
      %cst_15 = arith.constant dense<0.000000e+00> : vector<8xf32>
      %21 = vector.multi_reduction <add>, %20, %cst_15 [1] : vector<8x32xf32> to vector<8xf32>
      %22 = vector.shape_cast %21 : vector<8xf32> to vector<8x1xf32>
      %c0_16 = arith.constant 0 : index
      %c0_17 = arith.constant 0 : index
      %23 = vector.load %arg3[%c0_16, %c0_17] : memref<8x32xf32, #tpu.memory_space<vmem>>, vector<8x32xf32>
      %c0_18 = arith.constant 0 : index
      %c0_19 = arith.constant 0 : index
      %24 = vector.load %arg5[%c0_18, %c0_19] : memref<8x32xf32, #tpu.memory_space<vmem>>, vector<8x32xf32>
      %25 = arith.mulf %23, %24 : vector<8x32xf32>
      %cst_20 = arith.constant dense<0.000000e+00> : vector<8xf32>
      %26 = vector.multi_reduction <add>, %25, %cst_20 [1] : vector<8x32xf32> to vector<8xf32>
      %27 = vector.shape_cast %26 : vector<8xf32> to vector<8x1xf32>
      %28 = arith.subf %27, %22 : vector<8x1xf32>
      %cst_21 = arith.constant 0.000000e+00 : f32
      %29 = vector.broadcast %cst_21 : f32 to vector<8x1xf32>
      %30 = arith.maximumf %28, %29 : vector<8x1xf32>
      %31 = math.absf %28 : vector<8x1xf32>
      %cst_22 = arith.constant 0.000000e+00 : f32
      %32 = vector.broadcast %cst_22 : f32 to vector<8x1xf32>
      %33 = arith.subf %32, %31 : vector<8x1xf32>
      %34 = math.exp %33 : vector<8x1xf32>
      %35 = math.log1p %34 : vector<8x1xf32>
      %36 = arith.addf %30, %35 : vector<8x1xf32>
      %37 = vector.shape_cast %36 : vector<8x1xf32> to vector<1x8x1xf32>
      %cst_23 = arith.constant dense<0.000000e+00> : vector<1xf32>
      %38 = vector.multi_reduction <add>, %37, %cst_23 [1, 2] : vector<1x8x1xf32> to vector<1xf32>
      %39 = vector.shape_cast %38 : vector<1xf32> to vector<1x1x1xf32>
      %40 = vector.extract %39[0, 0, 0] : f32 from vector<1x1x1xf32>
      %cst_24 = arith.constant 8.000000e+00 : f32
      %41 = arith.divf %40, %cst_24 : f32
      %42 = vector.broadcast %41 : f32 to vector<8x128xf32>
      %c0_25 = arith.constant 0 : index
      %c0_26 = arith.constant 0 : index
      %c0_27 = arith.constant 0 : index
      %43 = vector.load %arg8[%c0_25, %c0_26, %c0_27] : memref<1x8x128xf32, #tpu.memory_space<vmem>>, vector<1x8x128xf32>
      %44 = vector.shape_cast %43 : vector<1x8x128xf32> to vector<8x128xf32>
      %45 = vector.shape_cast %42 : vector<8x128xf32> to vector<1x8x128xf32>
      tpu.vector_store %arg8[%c0_25, %c0_26, %c0_27], %45 {strides = array<i32>} : memref<1x8x128xf32, #tpu.memory_space<vmem>>, vector<1x8x128xf32>,
    } else {
    }
    %c0 = arith.constant 0 : index
    %c0_4 = arith.constant 0 : index
    %8 = vector.load %arg6[%c0, %c0_4] : memref<16x128xf32, #tpu.memory_space<vmem>>, vector<16x128xf32>
    %9 = arith.mulf %8, %8 : vector<16x128xf32>
    %c0_5 = arith.constant 0 : index
    %c0_6 = arith.constant 0 : index
    %c0_7 = arith.constant 0 : index
    %10 = vector.load %arg7[%c0_5, %c0_6, %c0_7] : memref<1x8x128xf32, #tpu.memory_space<vmem>>, vector<1x8x128xf32>
    %11 = vector.shape_cast %10 : vector<1x8x128xf32> to vector<8x128xf32>
    %12 = vector.shape_cast %9 : vector<16x128xf32> to vector<2x8x128xf32>
    %cst = arith.constant dense<0.000000e+00> : vector<8x128xf32>
    %13 = vector.multi_reduction <add>, %12, %cst [0] : vector<2x8x128xf32> to vector<8x128xf32>
    %14 = arith.addf %11, %13 : vector<8x128xf32>
    %c0_8 = arith.constant 0 : index
    %c0_9 = arith.constant 0 : index
    %c0_10 = arith.constant 0 : index
    %15 = vector.load %arg7[%c0_8, %c0_9, %c0_10] : memref<1x8x128xf32, #tpu.memory_space<vmem>>, vector<1x8x128xf32>
    %16 = vector.shape_cast %15 : vector<1x8x128xf32> to vector<8x128xf32>
    %17 = vector.shape_cast %14 : vector<8x128xf32> to vector<1x8x128xf32>
    tpu.vector_store %arg7[%c0_8, %c0_9, %c0_10], %17 {strides = array<i32>} : memref<1x8x128xf32, #tpu.memory_space<vmem>>, vector<1x8x128xf32>,
    return
  }
  func.func @transform_0(%arg0: i32, %arg1: i32) -> (i32, i32) {
    %c0_i32 = arith.constant 0 : i32
    %c0_i32_0 = arith.constant 0 : i32
    %c0_i32_1 = arith.constant 0 : i32
    return %c0_i32, %c0_i32_0 : i32, i32
  }
  func.func @transform_1(%arg0: i32, %arg1: i32) -> (i32, i32) {
    %c0_i32 = arith.constant 0 : i32
    %c0_i32_0 = arith.constant 0 : i32
    %c0_i32_1 = arith.constant 0 : i32
    return %c0_i32, %c0_i32_0 : i32, i32
  }
  func.func @transform_2(%arg0: i32, %arg1: i32) -> (i32, i32) {
    %c0_i32 = arith.constant 0 : i32
    %c0_i32_0 = arith.constant 0 : i32
    %c0_i32_1 = arith.constant 0 : i32
    return %c0_i32, %c0_i32_0 : i32, i32
  }
  func.func @transform_3(%arg0: i32, %arg1: i32) -> (i32, i32) {
    %c0_i32 = arith.constant 0 : i32
    %c0_i32_0 = arith.constant 0 : i32
    %c0_i32_1 = arith.constant 0 : i32
    return %c0_i32, %c0_i32_0 : i32, i32
  }
  func.func @transform_4(%arg0: i32, %arg1: i32) -> (i32, i32) {
    %c2_i32 = arith.constant 2 : i32
    %0 = arith.muli %arg0, %c2_i32 : i32
    %1 = arith.addi %0, %arg1 : i32
    %c0_i32 = arith.constant 0 : i32
    %c0_i32_0 = arith.constant 0 : i32
    return %1, %c0_i32 : i32, i32
  }
  func.func @transform_5(%arg0: i32, %arg1: i32) -> (i32, i32, i32) {
    %c0_i32 = arith.constant 0 : i32
    %c0_i32_0 = arith.constant 0 : i32
    %c0_i32_1 = arith.constant 0 : i32
    return %arg0, %c0_i32, %c0_i32_0 : i32, i32, i32
  }
  func.func @transform_6(%arg0: i32, %arg1: i32) -> (i32, i32, i32) {
    %c0_i32 = arith.constant 0 : i32
    %c0_i32_0 = arith.constant 0 : i32
    %c0_i32_1 = arith.constant 0 : i32
    return %arg0, %c0_i32, %c0_i32_0 : i32, i32, i32
  }
}

</mosaic_0001>

<bundles_post_ra>
// kernel: tpu_custom_call.1
= control target key start
LH: loop header
LB: loop body
LE: loop exit
PB: predicated region body
PF: predicated region fallthrough
CT: control target
= control target key end

     0   :  { %s1442_s0 = inlined_call_operand.hbm [shape: f32[8,32], index: 0, kind: input, shape index: {}]   ;;  %s1443_s1 = inlined_call_operand.hbm [shape: f32[8,32], index: 1, kind: input, shape index: {}]   ;;  %s1444_s2 = inlined_call_operand.hbm [shape: f32[8,32], index: 2, kind: input, shape index: {}]   ;;  %s1445_s3 = inlined_call_operand.hbm [shape: f32[8,32], index: 3, kind: input, shape index: {}]   ;;  %s1446_s4 = inlined_call_operand.hbm [shape: f32[64,128], index: 4, kind: input, shape index: {}]   ;;  %s1447_s5 = inlined_call_operand.hbm [shape: f32[2,8,128], index: 5, kind: output, shape index: {0}]   ;;  %s1448_s6 = inlined_call_operand.hbm [shape: f32[2,8,128], index: 6, kind: output, shape index: {1}]  }
   0x1   :  { %1458 = sst [smem:[#allocation27_spill]] %s1442_s0 }
   0x2   :  { %1459 = sst [smem:[#allocation28_spill]] %s1443_s1 }
   0x3   :  { %1460 = sst [smem:[#allocation29_spill]] %s1444_s2 }
   0x4   :  { %1461 = sst [smem:[#allocation30_spill]] %s1445_s3 }
   0x5   :  { %1462 = sst [smem:[#allocation31_spill]] %s1447_s5 }
   0x6   :  { %1463 = sst [smem:[#allocation32_spill]] %s1448_s6 }
   0x7   :  { %12 = vsyncpa [#allocation3], 0 }
   0x8   :  { %13 = vsyncpa [#allocation6], 0 }
   0x9   :  { %14 = vsyncpa [#allocation9], 0 }
   0xa   :  { %15 = vsyncpa [#allocation4], 0 }
   0xb   :  { %17 = vsyncpa [#allocation4 + $0x1], 0 }
   0xc   :  { %18 = vsyncpa [#allocation13], 0 }
   0xd   :  { %20 = vsyncpa [#allocation13 + $0x1], 0  ;;  %s1172_s21 = smov 0   ;;  %s1174_s22 = smov 0  }
   0xe   :  { %s1176_s23 = smov 0   ;;  %s1178_s24 = smov 0  }
   0xf   :  { %s1180_s25 = smov 0   ;;  %s1182_s26 = smov 0  }
  0x10   :  { %s1184_s27 = smov 0   ;;  %s1186_s28 = smov 0  }
  0x11   :  { %s1188_s29 = smov 0   ;;  %s1190_s30 = smov 0  }
  0x12   :  { %s1192_s7 = smov 0  }
  0x13 LB: > { %1464 = sst [smem:[#allocation20_spill]] %s1087_s21  ;;  %s1226_s8 = sadd.s32 4294967295, %s1127_s7   ;;  %s1127_s7 = sphi %s1192_s7, %s26_s7   ;;  %s1123_s30 = sphi %s1190_s30, %s1501_s30   ;;  %s1119_s29 = sphi %s1188_s29, %s1500_s29   ;;  %s1115_s28 = sphi %s1186_s28, %s1499_s28   ;;  %s1111_s27 = sphi %s1184_s27, %s1493_s27   ;;  %s1107_s26 = sphi %s1182_s26, %s1498_s26   ;;  %s1103_s25 = sphi %s1180_s25, %s1497_s25   ;;  %s1099_s24 = sphi %s1178_s24, %s1496_s24   ;;  %s1095_s23 = sphi %s1176_s23, %s1495_s23   ;;  %s1091_s22 = sphi %s1174_s22, %s1494_s22   ;;  %s1087_s21 = sphi %s1172_s21, %s1492_s21  }
  0x14   : > { %1465 = sst [smem:[#allocation21_spill]] %s1091_s22  ;;  %s620_s9 = sadd.s32 4294967294, %s1127_s7  }
  0x15   : > { %1466 = sst [smem:[#allocation22_spill]] %s1111_s27  ;;  %p146_p0 = scmp.ne.s32.totalorder %s1103_s25, %s1099_s24 }
  0x16   : > { %1467 = sst [smem:[#allocation23_spill]] %s1115_s28  ;;  %p147_p1 = scmp.eq.s32.totalorder %s1226_s8, 0 }
  0x17   : > { %1468 = sst [smem:[#allocation24_spill]] %s1119_s29  ;;  %p169_p2 = scmp.ne.s32.totalorder %s1095_s23, %s1091_s22 }
  0x18   : > { %p1236_p3 = por %p147_p1, %p146_p0  ;;  %p170_p4 = scmp.eq.s32.totalorder %s1226_s8, 3 }
  0x19   : > { %p175_p5 = scmp.ne.s32.totalorder %s1091_s22, %s1087_s21  ;;  %p176_p6 = scmp.eq.s32.totalorder %s620_s9, 3 }
  0x1a   : > { %p1243_p7 = por %p170_p4, %p169_p2  ;;  %p623_p8 = scmp.ge.s32.totalorder %s1127_s7, 1 }
  0x1b   : > { %p1248_p9 = por %p176_p6, %p175_p5  ;;  %p209_p10 = scmp.lt.s32.totalorder %s1127_s7, 5 }
  0x1c   : > { %s1470_s12 = scalar_select %p1243_p7, 1, 0 }
  0x1d   : > { %s1472_s13 = scalar_select %p1248_p9, 1, 0 }
  0x1e   : > { %1471 = sst [smem:[#allocation25_spill]] %s1470_s12  ;;  %p1256_p11 = pnand %p623_p8, %p209_p10 }
  0x1f   : > { %1473 = sst [smem:[#allocation26_spill]] %s1472_s13  ;;  %s1129_s18 = smov [#allocation2]  }
  0x20   : > { %s1474_s0 = sld [smem:[#allocation27_spill]]  ;;  %p675_p12 = pneg %p1256_p11 }
  0x21   : > { %s223_s19 = sshll.u32 %s1129_s18, 4  ;;  %s1476_s1 = sld [smem:[#allocation28_spill]]  ;;  %s224_s19 = int_to_ptr.vmem [resolvable:$true] %s223_s19 }
  0x22   : > { %p1267_p13 = pnand %p675_p12, %p147_p1  ;;  %s1478_s2 = sld [smem:[#allocation29_spill]] }
  0x23   : > { %s1130_s18 = smov [#allocation5]   ;;  %s1479_s3 = sld [smem:[#allocation30_spill]] }
  0x24   : > { %s235_s13 = sshll.u32 %s1130_s18, 4  ;;  %s1131_s14 = smov [#allocation7]   ;;  %s236_s13 = int_to_ptr.vmem [resolvable:$true] %s235_s13 }
  0x25   : > { %s247_s15 = sshll.u32 %s1131_s14, 4  ;;  %s621_s18 = sshll.u32 %s1123_s30, 1  ;;  %s248_s15 = int_to_ptr.vmem [resolvable:$true] %s247_s15 }
  0x26   : > { %s221_s16 = sshll.u32 %s1474_s0, 4  ;;  %s127_s20 = sadd.s32 %s1119_s29, %s621_s18  ;;  %s222_s16 = int_to_ptr.hbm [resolvable:$true] %s221_s16 }
  0x27   : > { %s233_s9 = sshll.u32 %s1476_s1, 4  ;;  %s133_s24 = sadd.s32 1, %s1107_s26  ;;  %s234_s9 = int_to_ptr.hbm [resolvable:$true] %s233_s9 }
  0x28   : > { %s245_s0 = sshll.u32 %s1478_s2, 4  ;;  %p140_p2 = scmp.ne.s32.totalorder %s1107_s26, %s1103_s25  ;;  %s246_s0 = int_to_ptr.hbm [resolvable:$true] %s245_s0 }
  0x29   : > { %678 = dma.hbm_to_vmem [thread:$0]  (!%p1267_p13), %s222_s16, 128, %s224_s19, [#allocation3]  }
  0x2a   : > { %681 = dma.hbm_to_vmem [thread:$0]  (!%p1267_p13), %s234_s9, 128, %s236_s13, [#allocation6]  }
  0x2b   : > { %s257_s1 = sshll.u32 %s1479_s3, 4  ;;  %s1132_s16 = smov [#allocation8]   ;;  %s258_s1 = int_to_ptr.hbm [resolvable:$true] %s257_s1 }
  0x2c   : > { %684 = dma.hbm_to_vmem [thread:$0]  (!%p1267_p13), %s246_s0, 128, %s248_s15, [#allocation6]  }
  0x2d   : > { %s259_s19 = sshll.u32 %s1132_s16, 4  ;;  %s35_s13 = sadd.s32 1, %s1119_s29  ;;  %s260_s19 = int_to_ptr.vmem [resolvable:$true] %s259_s19 }
  0x2e   : > { %687 = dma.hbm_to_vmem [thread:$0]  (!%p1267_p13), %s258_s1, 128, %s260_s19, [#allocation9]  }
  0x2f   : > { %s38_s9 = sadd.s32 1, %s1123_s30  ;;  %p36_p0 = scmp.ge.s32.totalorder %s35_s13, 2 }
  0x30   : > { %p141_p4 = scmp.eq.s32.totalorder %s1127_s7, 0  ;;  %p703_p6 = scmp.lt.s32.totalorder %s1127_s7, 4 }
  0x31   : > { %s1503_s13 = smov (%p36_p0, %s35_s13), 0  ;;  %s1505_s9 = smov (!%p36_p0, %s38_s9), %s1123_s30 }
  0x32   : > { %p40_p5 = scmp.ge.s32.totalorder %s1505_s9, 2  ;;  %p1297_p8 = por %p141_p4, %p140_p2 }
  0x33   : > { %s270_s1 = sand.u32 1, %s1127_s7   ;;  %s272_s10 = sand.u32 1, %s1107_s26  }
  0x34   : > { %s1507_s9 = smov (%p40_p5, %s1505_s9), 0  ;;  %s629_s18 = sshll.u32 %s272_s10, 4 }
  0x35   : > { %s622_s14 = sshll.u32 %s1507_s9, 1  ;;  %s156_s15 = ssub.s32 %s1123_s30, %s1507_s9 }
  0x36   : > { %s129_s16 = sadd.s32 %s622_s14, %s1503_s13  ;;  %p157_p10 = scmp.eq.s32.totalorder %s156_s15, 0 }
  0x37   : > { %s130_s19 = ssub.s32 %s127_s20, %s129_s16  ;;  %s1481_s2 = sadd.s32 1, %s1095_s23 }
  0x38   : > { %p131_p12 = scmp.eq.s32.totalorder %s130_s19, 0  ;;  %s648_s21 = sshll.u32 %s127_s20, 4 }
  0x39   : > { %s1312_s3 = scalar_select %p157_p10, %s1095_s23, %s1481_s2  }
  0x3a   : > { %s1315_s29 = scalar_select %p131_p12, %s1107_s26, %s133_s24  }
  0x3b   : > { %s274_s6 = scalar_lea.vmem [#allocation10], %s629_s18  ;;  %s281_s27 = scalar_lea.hbm %s1446_s4, %s648_s21 }
  0x3c   : > { %s284_s12 = sshll.u32 %s274_s6, 4  ;;  %s282_s22 = sshll.u32 %s281_s27, 4  ;;  %s285_s12 = int_to_ptr.vmem [resolvable:$true] %s284_s12  ;;  %s283_s22 = int_to_ptr.hbm [resolvable:$true] %s282_s22 }
  0x3d   : > { %p689_p13 = pnand %p703_p6, %p1297_p8  ;;  %s271_s10 = scalar_lea.sflag [#allocation3], %s270_s1 }
  0x3e   : > { %s1133_s14 = smov 128   ;;  %s1134_s15 = smov 8  }
  0x3f   : > { %691 = dma.hbm_to_vmem [thread:$0]  (!%p689_p13), %s283_s22, 256, %s285_s12, %s271_s10, %s1133_s14, %s1133_s14, %s1134_s15  }
  0x40   : > { %296 = sbr.rel (%p1256_p11) target bundleno = 488 (0x1e8), region = 40 }
  0x45   : > { %1062 = dma.done.wait (%p147_p1), [#allocation3], 128  }
  0x46   : > { %1064 = vsyncadd (%p147_p1), [#allocation3], 4294967168 }
  0x47   : > { %1066 = dma.done.wait (%p147_p1), [#allocation6], 256  }
  0x48   : > { %1068 = vsyncadd (%p147_p1), [#allocation6], 4294967040 }
  0x49   : > { %1070 = dma.done.wait (%p147_p1), [#allocation9], 128  }
  0x4a   : > { %1072 = vsyncadd (%p147_p1), [#allocation9], 4294967168  ;;  %s318_s2 = sand.u32 1, %s1226_s8   ;;  %s320_s5 = sand.u32 1, %s1103_s25  }
  0x4b   : > { %s1340_s6 = sshll.u32 %s320_s5, 4  ;;  %s319_s21 = scalar_lea.sflag [#allocation3], %s318_s2 }
  0x4c   : > { %s322_s22 = scalar_lea.vmem [#allocation10], %s1340_s6 }
  0x4d   : > { %1074 = dma.done.wait (%p1236_p3), %s319_s21, 256  }
  0x4e   : > { %1076 = vsyncadd (%p1236_p3), %s319_s21, 4294967040  ;;  %s1482_s27 = sld [smem:[#allocation21_spill]] }
  0x4f   : > { %s1483_s28 = sld [smem:[#allocation22_spill]] }
  0x54   : > { %s1348_s12 = sand.u32 1, %s1482_s27  }
  0x55   : > { %p360_p1 = scmp.eq.s32.totalorder %s1483_s28, 0  ;;  %s639_s17 = sshll.u32 %s1348_s12, 3 }
  0x56   : > { %s1352_s20 = scalar_lea.vmem [#allocation11], %s639_s17  ;;  %s1354_s8 = scalar_lea.vmem [#allocation12], %s639_s17 }
  0x57   : > { %p641_p11 = scmp.ne.s32.totalorder %s1483_s28, 0 }
  0x59   : > { %363 = sbr.rel (%p641_p11) target bundleno = 97 (0x61), region = 64 }
  0x5e   : > { %v1135_v0 = vmov 0.0  }
  0x5f   : > { %364 = vst [vmem:[%s1352_s20] sm:$0xff] %v1135_v0 }
  0x60   : > { %365 = vst [vmem:[%s1354_s8] sm:$0xff] %v1135_v0 }
  0x61 PF: > { %s1484_s11 = sld [smem:[#allocation23_spill]] }
  0x67   : > { %p366_p3 = scmp.eq.s32.totalorder %s1484_s11, 0 }
  0x69   : > { %p367_p0 = pnand %p366_p3, %p360_p1 }
  0x6b   : > { %370 = sbr.rel (%p367_p0) target bundleno = 453 (0x1c5), region = 68 }
  0x70   : > { %v371_v1 = vld [vmem:[#allocation2] sm:$0xff]  ;;  %v372_v2 = vld [vmem:[#allocation7] sm:$0xff]  ;;  %vm374_vm0 = vcmask 261120   ;;  %v378_v4 = vld [vmem:[#allocation5] sm:$0xff]  ;;  %vm400_vm2 = vcmask 7168   ;;  %v1136_v27 = vmov 8.0  }
  0x71   : > { %v373_v3 = vmul.f32 %v372_v2, %v371_v1  ;;  %v379_v5 = vld [vmem:[#allocation8] sm:$0xff] }
  0x72   : > { %v380_v7 = vmul.f32 %v379_v5, %v378_v4 }
  0x73   : > { %v375_v6 = vsel %vm374_vm0, %v373_v3, 0.0 }
  0x74   : > { %376 = vadd.xlane.f32.xlu0 %v375_v6  ;;  %v381_v8 = vsel %vm374_vm0, %v380_v7, 0.0 }
  0x7c   : > { %382 = vadd.xlane.f32.xlu0 %v381_v8 }
  0xe7   : > { %v377_v9 = vpop.xlane.xlu0 %376 }
  0xef   : > { %v383_v10 = vpop.xlane.xlu0 %382 }
  0xf0   : > { %v384_v11 = vsub.f32 %v383_v10, %v377_v9 }
  0xf2   : > { %v386_v12 = vand.u32 2147483647, %v384_v11  ;;  %v385_v23 = vmax.f32 %v384_v11, 0.0 }
  0xf4   : > { %v387_v13 = vsub.f32 0.0, %v386_v12 }
  0xf6   : > { %v388_v14 = vmul.f32 1.442695, %v387_v13 }
  0xf8   : > { %805 = vpow2.f32 %v388_v14 }
  0xfe   : > { %v806_v15 = vpop.eup %805 }
  0xff   : > { %v390_v16 = vadd.f32 1.0, %v806_v15  ;;  %v393_v17 = vmul.f32 -0.5, %v806_v15  ;;  %v396_v19 = vand.u32 2147483647, %v806_v15 }
 0x101   : > { %807 = vlog2.f32 %v390_v16  ;;  %v394_v18 = vadd.f32 1.0, %v393_v17  ;;  %vm397_vm1 = vcmp.lt.f32.partialorder %v396_v19, 0.0004427343 }
 0x102   : > { %809 = vrcp.f32 %v1136_v27 }
 0x103   : > { %v395_v22 = vmul.f32 %v806_v15, %v394_v18 }
 0x107   : > { %v808_v20 = vpop.eup %807 }
 0x108   : > { %v392_v21 = vmul.f32 0.6931472, %v808_v20  ;;  %v810_v28 = vpop.eup %809 }
 0x109   : > { %v412_v29 = vmul.f32 8.0, %v810_v28  ;;  %vm416_vm3 = vweird.f32 %v810_v28 }
 0x10a   : > { %v398_v24 = vsel %vm397_vm1, %v395_v22, %v392_v21 }
 0x10b   : > { %v399_v25 = vadd.f32 %v398_v24, %v385_v23  ;;  %v413_v30 = vsub.f32 1.0, %v412_v29 }
 0x10d   : > { %v401_v26 = vsel %vm400_vm2, %v399_v25, 0.0  ;;  %v414_v34 = vmul.f32 %v810_v28, %v413_v30 }
 0x10e   : > { %402 = vadd.xlane.f32.xlu1 %v401_v26 }
 0x10f   : > { %v415_v37 = vadd.f32 %v810_v28, %v414_v34 }
 0x111   : > { %v417_v40 = vsel %vm416_vm3, %v810_v28, %v415_v37 }
 0x181   : > { %v403_v31 = vpop.xlane.xlu1 %402 }
 0x182   : > { %v404_v32 = vrot.slane %v403_v31, 4 }
 0x184   : > { %v405_v33 = vadd.f32 %v404_v32, %v403_v31 }
 0x186   : > { %v406_v35 = vrot.slane %v405_v33, 2 }
 0x188   : > { %v407_v36 = vadd.f32 %v406_v35, %v405_v33 }
 0x18a   : > { %v408_v38 = vrot.slane %v407_v36, 1 }
 0x18c   : > { %v409_v39 = vadd.f32 %v408_v38, %v407_v36 }
 0x18e   : > { %649 = vpush %v409_v39 }
 0x18f   : > { %651 = vpush %v417_v40 }
 0x1bf   : > { %s650_s24 = spop %649 }
 0x1c0   : > { %s652_s0 = spop %651 }
 0x1c1   : > { %s419_s1 = smul.f32 %s652_s0, %s650_s24 }
 0x1c3   : > { %v420_v41 = vstv %s419_s1 }
 0x1c4   : > { %421 = vst [vmem:[%s1354_s8] sm:$0xff] %v420_v41 }
 0x1c5 PF: > { %s1485_s16 = sld [smem:[#allocation23_spill]]  ;;  %v422_v42 = vld [vmem:[%s322_s22] sm:$0xff]  ;;  %v423_v43 = vld [vmem:[%s322_s22 + $0x8] sm:$0xff]  ;;  %s448_s2 = sshll.u32 %s1352_s20, 4  ;;  %s1371_s2 = int_to_ptr.vmem [resolvable:$true] %s448_s2 }
 0x1c6   : > { %v424_v44 = vmul.f32 %v422_v42, %v422_v42  ;;  %v425_v45 = vmul.f32 %v423_v43, %v423_v43  ;;  %s1486_s14 = sld [smem:[#allocation31_spill]]  ;;  %v426_v46 = vld [vmem:[%s1352_s20] sm:$0xff]  ;;  %s462_s11 = sshll.u32 %s1354_s8, 4  ;;  %s463_s11 = int_to_ptr.vmem [resolvable:$true] %s462_s11 }
 0x1c7   : > { %s1488_s27 = sld [smem:[#allocation32_spill]]  ;;  %s436_s0 = scalar_lea.sflag [#allocation13], %s1348_s12 }
 0x1c8   : > { %v427_v47 = vadd.f32 %v425_v45, %v424_v44 }
 0x1ca   : > { %v428_v48 = vadd.f32 %v427_v47, %v426_v46 }
 0x1cb   : > { %s644_s19 = sshll.u32 %s1485_s16, 3 }
 0x1cc   : > { %s446_s15 = scalar_lea.hbm %s1486_s14, %s644_s19  ;;  %429 = vst [vmem:[%s1352_s20] sm:$0xff] %v428_v48 }
 0x1cd   : > { %s450_s21 = sshll.u32 %s446_s15, 4  ;;  %s1489_s17 = smov %s1488_s27  ;;  %s1373_s21 = int_to_ptr.hbm [resolvable:$true] %s450_s21 }
 0x1ce   : > { %s460_s28 = scalar_lea.hbm %s1488_s27, %s644_s19  ;;  %s981_s15 = scalar_lea.hbm %s1489_s17, 16 }
 0x1cf   : > { %s464_s24 = sshll.u32 %s460_s28, 4  ;;  %s465_s24 = int_to_ptr.hbm [resolvable:$true] %s464_s24 }
 0x1d0   : > { %s975_s1 = sshra.s32 %s465_s24, 4  ;;  %s976_s1 = int_to_ptr.hbm [resolvable:$true] %s975_s1 }
 0x1d1   : > { %s977_s16 = scalar_lea.hbm %s976_s1, 8  ;;  %p982_p6 = scmp.lt.s32.totalorder %s976_s1, %s1489_s17 }
 0x1d2   : > { %p978_p2 = scmp.ne.s32.totalorder %s976_s1, %s977_s16  ;;  %p983_p8 = scmp.lt.s32.totalorder %s981_s15, %s977_s16 }
 0x1d4   : > { %p979_p4 = pnand %p978_p2, %p1243_p7  ;;  %p984_p10 = por %p983_p8, %p982_p6 }
 0x1d6   : > { %p980_p5 = pneg %p979_p4 }
 0x1d8   : > { %p985_p12 = pnand %p984_p10, %p980_p5 }
 0x1da   : > { %988 = shalt.err (!%p985_p12)
}
 0x1db   : > { %672 = dma.vmem_to_hbm [thread:$0]  (%p1243_p7), %s463_s11, 128, %s465_s24, %s436_s0  }
 0x1dc   : > { %s431_s20 = scalar_lea.sflag [#allocation4], %s1348_s12  ;;  %s1003_s8 = sshra.s32 %s1373_s21, 4  ;;  %s1004_s8 = int_to_ptr.hbm [resolvable:$true] %s1003_s8 }
 0x1dd   : > { %s1005_s22 = scalar_lea.hbm %s1004_s8, 8  ;;  %s1009_s1 = scalar_lea.hbm %s1486_s14, 16 }
 0x1de   : > { %p1006_p13 = scmp.ne.s32.totalorder %s1004_s8, %s1005_s22  ;;  %p1010_p3 = scmp.lt.s32.totalorder %s1004_s8, %s1486_s14 }
 0x1df   : > { %p1011_p0 = scmp.lt.s32.totalorder %s1009_s1, %s1005_s22 }
 0x1e0   : > { %p1007_p1 = pnand %p1006_p13, %p1243_p7 }
 0x1e1   : > { %p1012_p2 = por %p1011_p0, %p1010_p3 }
 0x1e2   : > { %p1008_p11 = pneg %p1007_p1 }
 0x1e4   : > { %p1013_p4 = pnand %p1012_p2, %p1008_p11 }
 0x1e6   : > { %1016 = shalt.err (!%p1013_p4)
}
 0x1e7   : > { %671 = dma.vmem_to_hbm [thread:$0]  (%p1243_p7), %s1371_s2, 128, %s1373_s21, %s431_s20  }
 0x1e8 PF: > { %s1490_s12 = sld [smem:[#allocation20_spill]]  ;;  %p708_p5 = scmp.ge.s32.totalorder %s1127_s7, 2 }
 0x1ea   : > { %p693_p6 = pnand %p708_p5, %p1248_p9 }
 0x1ec   : > { %p694_p8 = pneg %p693_p6 }
 0x1ee   : > { %s476_s24 = sand.u32 1, %s1490_s12  }
 0x1ef   : > { %s477_s0 = scalar_lea.sflag [#allocation4], %s476_s24 }
 0x1f0   : > { %1078 = dma.done.wait (%p694_p8), %s477_s0, 128  }
 0x1f1   : > { %1080 = vsyncadd (%p694_p8), %s477_s0, 4294967168  ;;  %s487_s10 = scalar_lea.sflag [#allocation13], %s476_s24 }
 0x1f2   : > { %1082 = dma.done.wait (%p694_p8), %s487_s10, 128  }
 0x1f3   : > { %1084 = vsyncadd (%p694_p8), %s487_s10, 4294967168  ;;  %s26_s7 = sadd.s32 1, %s1127_s7   ;;  %s1492_s21 = sld [smem:[#allocation21_spill]] }
 0x1f4   : > { %p23_p10 = scmp.ge.s32.totalorder %s26_s7, 6   ;;  %s1493_s27 = sld [smem:[#allocation24_spill]] }
 0x1f5   : > { %s1494_s22 = smov %s1095_s23  ;;  %s1495_s23 = smov %s1312_s3 }
 0x1f6   : > { %s1496_s24 = smov %s1103_s25  ;;  %s1497_s25 = smov %s1107_s26 }
 0x1f7   : > { %s1498_s26 = smov %s1315_s29  ;;  %s1499_s28 = smov %s1123_s30 }
 0x1f8   : > { %s1500_s29 = smov %s1503_s13  ;;  %s1501_s30 = smov %s1507_s9 }
 0x1f9   :  { %25 = sbr.rel (!%p23_p10) target bundleno = 19 (0x13), region = 125 }
 0x1fe   :  { %493 = vsyncpa [#allocation3], 1 }
 0x1ff   :  { %495 = vsyncpa [#allocation3 + $0x1], 1 }
 0x200   :  { %496 = vsyncpa [#allocation6], 1 }
 0x201   :  { %497 = vsyncpa [#allocation9], 1 }
 0x202   :  { %498 = vsyncpa [#allocation4], 1 }
 0x203   :  { %500 = vsyncpa [#allocation4 + $0x1], 1 }
 0x204   :  { %501 = vsyncpa [#allocation13], 1 }
 0x205   :  { %503 = vsyncpa [#allocation13 + $0x1], 1 }

</bundles_post_ra>
